<compile_context>
chip_gen: v7x
topology: tpu7x:2x2x1
jax: 0.10.0
libtpu: 0.0.40
codegen_flags: <defaults>
</compile_context>

<pallas_src>
import math

import jax
import jax.numpy as jnp
from jax.experimental import pallas as pl
from jax.experimental.pallas import tpu as pltpu


def _round_up(x, m):
    return ((x + m - 1) // m) * m


def _inverse_model_kernel(ft_ref, ftp1_ref, w1a_ref, w1b_ref, b1_ref,
                          w2_ref, b2_ref, out_ref):
    cdt = w1a_ref.dtype
    # First Linear on the (virtual) concat, expressed as two matmuls.
    h = jnp.dot(ft_ref[...].astype(cdt), w1a_ref[...],
                preferred_element_type=jnp.float32)
    h = h + jnp.dot(ftp1_ref[...].astype(cdt), w1b_ref[...],
                    preferred_element_type=jnp.float32)
    h = h + b1_ref[...]                  # f32 broadcast bias add (VPU)
    h = jnp.maximum(h, 0.2 * h)          # LeakyReLU(0.2): mul+max, no select

    # Second Linear (H -> A), narrow output stored directly (B, A).
    o = jnp.dot(h.astype(w2_ref.dtype), w2_ref[...],
                preferred_element_type=jnp.float32)
    o = o + b2_ref[...]
    out_ref[...] = o.astype(out_ref.dtype)


def prepare_params(params, compute_dtype=jnp.bfloat16):
    """One-time weight prep (hoist out of the per-call path).

    Splits W1 for concat elimination, casts matmul operands to compute_dtype,
    and keeps biases as f32 row vectors.  Call once at init and reuse.
    """
    w1, b1, w2, b2 = params["w1"], params["b1"], params["w2"], params["b2"]
    two_f, hidden = w1.shape
    feat = two_f // 2
    assert two_f == 2 * feat
    return {
        "w1a": w1[:feat].astype(compute_dtype),
        "w1b": w1[feat:].astype(compute_dtype),
        "b1": b1.reshape(1, hidden).astype(jnp.float32),
        "w2": w2.astype(compute_dtype),
        "b2": b2.reshape(1, -1).astype(jnp.float32),
    }


def inverse_model_forward(f_t, f_tp1, prepared, *, block_batch=2048):
    """Pallas forward pass of InverseModel.

    f_t, f_tp1 : (B, F) float32 or bfloat16
    prepared   : output of prepare_params() — w1a/w1b (F, H), b1 (1, H),
                 w2 (H, A), b2 (1, A)   (weights stored (in, out))
    returns    : (B, A) float32 logits
    """
    w1a, w1b, b1 = prepared["w1a"], prepared["w1b"], prepared["b1"]
    w2, b2 = prepared["w2"], prepared["b2"]
    B, F = f_t.shape
    H = w1a.shape[1]
    A = w2.shape[1]
    assert w1a.shape == (F, H) and w1b.shape == (F, H) and w2.shape == (H, A)

    # Batch tiling: no host-side padding (a partial last tile is masked on
    # writeback).  Keep >= 2 grid steps when the batch allows it so the
    # "parallel" batch axis can be sharded across v7x's two TensorCores.
    if B <= 8:
        tb = B                                   # single block == full array
    else:
        tb = min(block_batch, _round_up(pl.cdiv(B, 2), 8))
    grid = (pl.cdiv(B, tb),)

    out = pl.pallas_call(
        _inverse_model_kernel,
        out_shape=jax.ShapeDtypeStruct((B, A), jnp.float32),
        grid=grid,
        in_specs=[
            pl.BlockSpec((tb, F), lambda i: (i, 0)),    # f_t tile
            pl.BlockSpec((tb, F), lambda i: (i, 0)),    # f_tp1 tile
            pl.BlockSpec((F, H), lambda i: (0, 0)),     # w1a (VMEM resident)
            pl.BlockSpec((F, H), lambda i: (0, 0)),     # w1b (VMEM resident)
            pl.BlockSpec((1, H), lambda i: (0, 0)),     # b1  (VMEM resident)
            pl.BlockSpec((H, A), lambda i: (0, 0)),     # w2  (VMEM resident)
            pl.BlockSpec((1, A), lambda i: (0, 0)),     # b2  (VMEM resident)
        ],
        out_specs=pl.BlockSpec((tb, A), lambda i: (i, 0)),
        compiler_params=pltpu.CompilerParams(
            dimension_semantics=("parallel",),
        ),
    )(f_t, f_tp1, w1a, w1b, b1, w2, b2)

    return out


def init_params(key, feature_dim, action_dim, hidden_dim):
    """Deterministic init matching PyTorch nn.Linear default (uniform +/- 1/sqrt(fan_in))."""
    k1, k2, k3, k4 = jax.random.split(key, 4)
    fan1 = 2 * feature_dim
    bound1 = 1.0 / math.sqrt(fan1)
    fan2 = hidden_dim
    bound2 = 1.0 / math.sqrt(fan2)
    w1 = jax.random.uniform(k1, (fan1, hidden_dim), jnp.float32, -bound1, bound1)
    b1 = jax.random.uniform(k2, (1, hidden_dim), jnp.float32, -bound1, bound1)
    w2 = jax.random.uniform(k3, (hidden_dim, action_dim), jnp.float32, -bound2, bound2)
    b2 = jax.random.uniform(k4, (1, action_dim), jnp.float32, -bound2, bound2)
    return {"w1": w1, "b1": b1, "w2": w2, "b2": b2}


def reference_forward(f_t, f_tp1, params, cast_dtype=None):
    """Pure-JAX reference.  cast_dtype emulates the kernel's mixed precision."""
    def q(a):
        if cast_dtype is None:
            return a
        return a.astype(cast_dtype).astype(jnp.float32)

    x = jnp.concatenate([q(f_t), q(f_tp1)], axis=1)
    h = x @ q(params["w1"]) + params["b1"]
    h = jnp.where(h >= 0, h, 0.2 * h)
    return q(h) @ q(params["w2"]) + params["b2"]


if __name__ == "__main__":
    feature_dim, action_dim, hidden_dim, batch = 32, 8, 32, 8

    key = jax.random.PRNGKey(0)
    kp, ka, kb = jax.random.split(key, 3)
    params = init_params(kp, feature_dim, action_dim, hidden_dim)
    f_t = jax.random.normal(ka, (batch, feature_dim), jnp.float32)
    f_tp1 = jax.random.normal(kb, (batch, feature_dim), jnp.float32)

    prepared = prepare_params(params)           # one-time weight prep
    out = inverse_model_forward(f_t, f_tp1, prepared)
    out = jax.block_until_ready(out)
    assert out.shape == (batch, action_dim)
    assert out.dtype == jnp.float32

    # Check against a reference with the same bf16 operand quantization.
    ref_mixed = reference_forward(f_t, f_tp1, params, cast_dtype=jnp.bfloat16)
    assert jnp.allclose(out, ref_mixed, atol=1e-3, rtol=1e-3)

    # Sanity check against the pure-f32 PyTorch-equivalent forward.
    ref_f32 = reference_forward(f_t, f_tp1, params)
    assert jnp.allclose(out, ref_f32, atol=5e-2, rtol=5e-2)

    print("KERNEL_OK")
</pallas_src>

<mosaic_0001>
module attributes {stable_mosaic.version = 11 : i64} {
  func.func @_inverse_model_kernel(%arg0: i32, %arg1: memref<8x32xf32, #tpu.memory_space<vmem>>, %arg2: memref<8x32xf32, #tpu.memory_space<vmem>>, %arg3: memref<32x32xbf16, #tpu.memory_space<vmem>>, %arg4: memref<32x32xbf16, #tpu.memory_space<vmem>>, %arg5: memref<1x32xf32, #tpu.memory_space<vmem>>, %arg6: memref<32x8xbf16, #tpu.memory_space<vmem>>, %arg7: memref<1x8xf32, #tpu.memory_space<vmem>>, %arg8: memref<8x8xf32, #tpu.memory_space<vmem>>) attributes {dimension_semantics = [#tpu.dimension_semantics<parallel>], iteration_bounds = array<i64: 1>, scalar_prefetch = 0 : i64, scratch_operands = 0 : i64, tpu.core_type = #tpu.core_type<tc>, window_params = [{transform_indices = @transform_0, window_bounds = array<i64: 8, 32>}, {transform_indices = @transform_1, window_bounds = array<i64: 8, 32>}, {pipeline_mode = #tpu.pipeline_mode<synchronous>, transform_indices = @transform_2, window_bounds = array<i64: 32, 32>}, {pipeline_mode = #tpu.pipeline_mode<synchronous>, transform_indices = @transform_3, window_bounds = array<i64: 32, 32>}, {pipeline_mode = #tpu.pipeline_mode<synchronous>, transform_indices = @transform_4, window_bounds = array<i64: 1, 32>}, {pipeline_mode = #tpu.pipeline_mode<synchronous>, transform_indices = @transform_5, window_bounds = array<i64: 32, 8>}, {pipeline_mode = #tpu.pipeline_mode<synchronous>, transform_indices = @transform_6, window_bounds = array<i64: 1, 8>}, {transform_indices = @transform_7, window_bounds = array<i64: 8, 8>}]} {
    %c0 = arith.constant 0 : index
    %c0_0 = arith.constant 0 : index
    %0 = vector.load %arg1[%c0, %c0_0] : memref<8x32xf32, #tpu.memory_space<vmem>>, vector<8x32xf32>
    %1 = arith.truncf %0 : vector<8x32xf32> to vector<8x32xbf16>
    %c0_1 = arith.constant 0 : index
    %c0_2 = arith.constant 0 : index
    %2 = vector.load %arg3[%c0_1, %c0_2] : memref<32x32xbf16, #tpu.memory_space<vmem>>, vector<32x32xbf16>
    %cst = arith.constant dense<0.000000e+00> : vector<8x32xf32>
    %3 = tpu.matmul %1, %2, %cst {dimension_numbers = #tpu.dot_dimension_numbers<[1], [0], [0], [1], [0, 0, 1, 1], [], []>} : vector<8x32xbf16>, vector<32x32xbf16>, vector<8x32xf32> -> vector<8x32xf32>
    %c0_3 = arith.constant 0 : index
    %c0_4 = arith.constant 0 : index
    %4 = vector.load %arg2[%c0_3, %c0_4] : memref<8x32xf32, #tpu.memory_space<vmem>>, vector<8x32xf32>
    %5 = arith.truncf %4 : vector<8x32xf32> to vector<8x32xbf16>
    %c0_5 = arith.constant 0 : index
    %c0_6 = arith.constant 0 : index
    %6 = vector.load %arg4[%c0_5, %c0_6] : memref<32x32xbf16, #tpu.memory_space<vmem>>, vector<32x32xbf16>
    %cst_7 = arith.constant dense<0.000000e+00> : vector<8x32xf32>
    %7 = tpu.matmul %5, %6, %cst_7 {dimension_numbers = #tpu.dot_dimension_numbers<[1], [0], [0], [1], [0, 0, 1, 1], [], []>} : vector<8x32xbf16>, vector<32x32xbf16>, vector<8x32xf32> -> vector<8x32xf32>
    %8 = arith.addf %3, %7 : vector<8x32xf32>
    %c0_8 = arith.constant 0 : index
    %c0_9 = arith.constant 0 : index
    %9 = vector.load %arg5[%c0_8, %c0_9] : memref<1x32xf32, #tpu.memory_space<vmem>>, vector<1x32xf32>
    %10 = vector.broadcast %9 : vector<1x32xf32> to vector<8x32xf32>
    %11 = arith.addf %8, %10 : vector<8x32xf32>
    %cst_10 = arith.constant 2.000000e-01 : f32
    %12 = vector.broadcast %cst_10 : f32 to vector<8x32xf32>
    %13 = arith.mulf %12, %11 : vector<8x32xf32>
    %14 = arith.maximumf %11, %13 : vector<8x32xf32>
    %15 = arith.truncf %14 : vector<8x32xf32> to vector<8x32xbf16>
    %c0_11 = arith.constant 0 : index
    %c0_12 = arith.constant 0 : index
    %16 = vector.load %arg6[%c0_11, %c0_12] : memref<32x8xbf16, #tpu.memory_space<vmem>>, vector<32x8xbf16>
    %cst_13 = arith.constant dense<0.000000e+00> : vector<8x8xf32>
    %17 = tpu.matmul %15, %16, %cst_13 {dimension_numbers = #tpu.dot_dimension_numbers<[1], [0], [0], [1], [0, 0, 1, 1], [], []>} : vector<8x32xbf16>, vector<32x8xbf16>, vector<8x8xf32> -> vector<8x8xf32>
    %c0_14 = arith.constant 0 : index
    %c0_15 = arith.constant 0 : index
    %18 = vector.load %arg7[%c0_14, %c0_15] : memref<1x8xf32, #tpu.memory_space<vmem>>, vector<1x8xf32>
    %19 = vector.broadcast %18 : vector<1x8xf32> to vector<8x8xf32>
    %20 = arith.addf %17, %19 : vector<8x8xf32>
    %c0_16 = arith.constant 0 : index
    %c0_17 = arith.constant 0 : index
    %21 = vector.load %arg8[%c0_16, %c0_17] : memref<8x8xf32, #tpu.memory_space<vmem>>, vector<8x8xf32>
    tpu.vector_store %arg8[%c0_16, %c0_17], %20 {strides = array<i32>} : memref<8x8xf32, #tpu.memory_space<vmem>>, vector<8x8xf32>,
    return
  }
  func.func @transform_0(%arg0: i32) -> (i32, i32) {
    %c0_i32 = arith.constant 0 : i32
    %c0_i32_0 = arith.constant 0 : i32
    return %arg0, %c0_i32 : i32, i32
  }
  func.func @transform_1(%arg0: i32) -> (i32, i32) {
    %c0_i32 = arith.constant 0 : i32
    %c0_i32_0 = arith.constant 0 : i32
    return %arg0, %c0_i32 : i32, i32
  }
  func.func @transform_2(%arg0: i32) -> (i32, i32) {
    %c0_i32 = arith.constant 0 : i32
    %c0_i32_0 = arith.constant 0 : i32
    %c0_i32_1 = arith.constant 0 : i32
    return %c0_i32, %c0_i32_0 : i32, i32
  }
  func.func @transform_3(%arg0: i32) -> (i32, i32) {
    %c0_i32 = arith.constant 0 : i32
    %c0_i32_0 = arith.constant 0 : i32
    %c0_i32_1 = arith.constant 0 : i32
    return %c0_i32, %c0_i32_0 : i32, i32
  }
  func.func @transform_4(%arg0: i32) -> (i32, i32) {
    %c0_i32 = arith.constant 0 : i32
    %c0_i32_0 = arith.constant 0 : i32
    %c0_i32_1 = arith.constant 0 : i32
    return %c0_i32, %c0_i32_0 : i32, i32
  }
  func.func @transform_5(%arg0: i32) -> (i32, i32) {
    %c0_i32 = arith.constant 0 : i32
    %c0_i32_0 = arith.constant 0 : i32
    %c0_i32_1 = arith.constant 0 : i32
    return %c0_i32, %c0_i32_0 : i32, i32
  }
  func.func @transform_6(%arg0: i32) -> (i32, i32) {
    %c0_i32 = arith.constant 0 : i32
    %c0_i32_0 = arith.constant 0 : i32
    %c0_i32_1 = arith.constant 0 : i32
    return %c0_i32, %c0_i32_0 : i32, i32
  }
  func.func @transform_7(%arg0: i32) -> (i32, i32) {
    %c0_i32 = arith.constant 0 : i32
    %c0_i32_0 = arith.constant 0 : i32
    return %arg0, %c0_i32 : i32, i32
  }
}

</mosaic_0001>

<bundles_post_ra>
// kernel: tpu_custom_call.1
= control target key start
LH: loop header
LB: loop body
LE: loop exit
PB: predicated region body
PF: predicated region fallthrough
CT: control target
= control target key end

     0   :  { %12 = vsyncpa [#allocation3], 0  ;;  %s518_s0 = inlined_call_operand.vmem [shape: f32[8,32], index: 0, kind: input, shape index: {}]   ;;  %s519_s1 = inlined_call_operand.hbm [shape: f32[8,32], index: 1, kind: input, shape index: {}]   ;;  %s520_s2 = inlined_call_operand.vmem [shape: bf16[32,32], index: 2, kind: input, shape index: {}]   ;;  %s521_s3 = inlined_call_operand.hbm [shape: bf16[32,32], index: 3, kind: input, shape index: {}]   ;;  %s522_s4 = inlined_call_operand.vmem [shape: f32[1,32], index: 4, kind: input, shape index: {}]   ;;  %s523_s5 = inlined_call_operand.vmem [shape: bf16[32,8], index: 5, kind: input, shape index: {}]   ;;  %s524_s6 = inlined_call_operand.vmem [shape: f32[1,8], index: 6, kind: input, shape index: {}]   ;;  %s525_s7 = inlined_call_operand.hbm [shape: f32[8,8], index: 7, kind: output, shape index: {}]  }
   0x1   :  { %13 = vsyncpa [#allocation6], 0 }
   0x2   :  { %14 = vsyncpa [#allocation4], 0  ;;  %s401_s24 = smov [#allocation2]   ;;  %s402_s26 = smov [#allocation5]  }
   0x3   :  { %s23_s25 = sshll.u32 %s401_s24, 4  ;;  %s34_s27 = sshll.u32 %s402_s26, 4  ;;  %s24_s25 = int_to_ptr.vmem [resolvable:$true] %s23_s25  ;;  %s448_s27 = int_to_ptr.vmem [resolvable:$true] %s34_s27 }
   0x4   :  { %s329_s30 = scalar_lea.hbm %s519_s1, 128 }
   0x5   :  { %p330_p0 = scmp.ne.s32.totalorder %s519_s1, %s329_s30  ;;  %p333_p1 = scmp.lt.u32.totalorder %s329_s30, %s519_s1 }
   0x7   :  { %p335_p2 = pnand %p333_p1, %p330_p0 }
   0x9   :  { %338 = shalt.err (!%p335_p2)
}
   0xa   :  { %s339_s12 = scalar_lea.vmem %s24_s25, 128  ;;  %p344_p4 = scmp.lt.s32.totalorder %s24_s25, %s24_s25 }
   0xb   :  { %p340_p3 = scmp.ne.s32.totalorder %s24_s25, %s339_s12  ;;  %p345_p5 = scmp.lt.s32.totalorder %s339_s12, %s339_s12 }
   0xd   :  { %p346_p6 = por %p345_p5, %p344_p4 }
   0xf   :  { %p347_p7 = pnand %p346_p6, %p340_p3 }
  0x11   :  { %350 = shalt.err (!%p347_p7)
}
  0x12   :  { %26 = dma.hbm_to_vmem [thread:$0]  %s519_s1, 128, %s24_s25, [#allocation3]  }
  0x13   :  { %s351_s17 = scalar_lea.hbm %s521_s3, 256 }
  0x14   :  { %p352_p8 = scmp.ne.s32.totalorder %s521_s3, %s351_s17  ;;  %p355_p9 = scmp.lt.u32.totalorder %s351_s17, %s521_s3 }
  0x16   :  { %p357_p10 = pnand %p355_p9, %p352_p8 }
  0x18   :  { %360 = shalt.err (!%p357_p10)
}
  0x19   :  { %s361_s22 = scalar_lea.vmem %s448_s27, 256  ;;  %p366_p12 = scmp.lt.s32.totalorder %s448_s27, %s448_s27 }
  0x1a   :  { %p362_p11 = scmp.ne.s32.totalorder %s448_s27, %s361_s22  ;;  %p367_p13 = scmp.lt.s32.totalorder %s361_s22, %s361_s22 }
  0x1c   :  { %p368_p0 = por %p367_p13, %p366_p12 }
  0x1e   :  { %p369_p1 = pnand %p368_p0, %p362_p11 }
  0x20   :  { %372 = shalt.err (!%p369_p1)
}
  0x21   :  { %s403_s1 = smov 64   ;;  %s404_s23 = smov 4  }
  0x22   :  { %40 = dma.hbm_to_vmem [thread:$0]  %s521_s3, 256, %s448_s27, [#allocation6], %s403_s1, %s403_s1, %s404_s23  }
  0x23   :  { %395 = dma.done.wait [#allocation3], 128  }
  0x24   :  { %396 = vsyncadd [#allocation3], 4294967168 }
  0x25   :  { %397 = dma.done.wait [#allocation6], 256  }
  0x26   :  { %398 = vsyncadd [#allocation6], 4294967040  ;;  %v405_v0 = vmov 0.0   ;;  %vm406_vm0 = vmmov 0   ;;  %v323_v1 = vld [vmem:[#allocation5] sm:$0xff]   ;;  %v324_v2 = vld [vmem:[%s520_s2] sm:$0xff]  }
  0x27   :  { %292 = vmatprep.subr.bf16.mxu0 %v405_v0  ;;  %300 = vmatprep.subr.bf16.mxu1 %v405_v0  ;;  %v325_v3 = vld [vmem:[#allocation5 + $0x8] sm:$0xff]   ;;  %v326_v4 = vld [vmem:[%s520_s2 + $0x8] sm:$0xff]   ;;  %v60_v5 = vld [vmem:[#allocation2] sm:$0xff]  ;;  %vm78_vm1 = vcmask 261120   ;;  %s407_s13 = smov [#allocation7]   ;;  %vm254_vm2 = vcmask 64512  }
  0x28   :  { %296 = vmatprep.mubr.msk.bf16.mxu0 %vm406_vm0, %v405_v0  ;;  %304 = vmatprep.mubr.msk.bf16.mxu1 %vm406_vm0, %v405_v0  ;;  %v54_v6 = vld [vmem:[%s518_s0] sm:$0xff]  ;;  %v61_v7 = vpack.c.bf16 %v60_v5, %v60_v5  ;;  %v328_v10 = vld [vmem:[%s523_s5 + $0x8] sm:$0xff]   ;;  %s262_s14 = sshll.u32 %s407_s13, 4  ;;  %s263_s14 = int_to_ptr.vmem [resolvable:$true] %s262_s14 }
  0x29   :  { %293 = vmatpush3.bf16.msra.mxu0 %v323_v1  ;;  %301 = vmatpush3.bf16.msra.mxu1 %v324_v2  ;;  %v55_v8 = vpack.c.bf16 %v54_v6, %v54_v6  ;;  %v327_v9 = vld [vmem:[%s523_s5] sm:$0xff]   ;;  %p378_p3 = scmp.lt.s32.totalorder %s263_s14, %s263_s14 }
  0x2a   :  { %294 = vmatprep.subr.bf16.mxu0 %v405_v0  ;;  %302 = vmatprep.subr.bf16.mxu1 %v405_v0  ;;  %v278_v13 = vld [vmem:[%s522_s4] ss:$0 sm:$0xff]  ;;  %s373_s4 = scalar_lea.vmem %s263_s14, 128 }
  0x2b   :  { %v279_v25 = vld [vmem:[%s524_s6] ss:$0 sm:$0xff]  ;;  %p374_p2 = scmp.ne.s32.totalorder %s263_s14, %s373_s4  ;;  %p379_p4 = scmp.lt.s32.totalorder %s373_s4, %s373_s4 }
  0x2d   :  { %295 = vmatpush3.bf16.msra.mxu0 %v325_v3  ;;  %303 = vmatpush3.bf16.msra.mxu1 %v326_v4  ;;  %p380_p5 = por %p379_p4, %p378_p3 }
  0x2e   :  { %308 = vmatprep.subr.bf16.mxu0 %v405_v0 }
  0x2f   :  { %p381_p6 = pnand %p380_p5, %p374_p2 }
  0x30   :  { %297 = vmatmul.mubr.msk.bf16.vlgmr.msra.gmra.mrb[0].mxu0 %vm78_vm1, %v61_v7  ;;  %305 = vmatmul.mubr.msk.bf16.vlgmr.msra.gmra.mrb[0].mxu1 %vm78_vm1, %v55_v8 }
  0x31   :  { %312 = vmatprep.mubr.msk.bf16.mxu0 %vm406_vm0, %v405_v0  ;;  %309 = vmatpush3.bf16.msra.mxu0 %v327_v9 }
  0x32   :  { %310 = vmatprep.subr.bf16.mxu0 %v405_v0 }
  0x35   :  { %311 = vmatpush3.bf16.msra.mxu0 %v328_v10 }
 0x103   :  { %v116_v11 = vpop.f32.mrb[0].mxu0  ;;  %v171_v12 = vpop.f32.mrb[0].mxu1 }
 0x104   :  { %v298_v14 = vpop.f32.mrb[1].mxu0  ;;  %v172_v15 = vadd.f32 %v171_v12, %v116_v11  ;;  %v306_v16 = vpop.f32.mrb[1].mxu1 }
 0x105   :  { %v119_v17 = vpop.f32.mrb[2].mxu0  ;;  %v174_v18 = vpop.f32.mrb[2].mxu1 }
 0x106   :  { %v299_v19 = vpop.f32.mrb[3].mxu0  ;;  %v184_v20 = vadd.f32 %v278_v13, %v172_v15  ;;  %v307_v21 = vpop.f32.mrb[3].mxu1 }
 0x108   :  { %v185_v22 = vmul.f32 0.2, %v184_v20 }
 0x10a   :  { %v186_v23 = vmax.f32 %v184_v20, %v185_v22 }
 0x10c   :  { %v187_v24 = vpack.c.bf16 %v186_v23, %v186_v23 }
 0x10e   :  { %313 = vmatmul.mubr.msk.bf16.vlgmr.msra.gmra.mrb[4].mxu0 %vm78_vm1, %v187_v24 }
 0x1e1   :  { %v248_v26 = vpop.f32.mrb[4].mxu0 }
 0x1e2   :  { %v249_v27 = vadd.f32 %v279_v25, %v248_v26  ;;  %v314_v28 = vpop.f32.mrb[5].mxu0 }
 0x1e3   :  { %v251_v29 = vpop.f32.mrb[6].mxu0 }
 0x1e4   :  { %v315_v30 = vpop.f32.mrb[7].mxu0  ;;  %255 = vst.msk [vmem:[#allocation7] sm:$0xff] %vm254_vm2, %v249_v27 }
 0x1e5   :  { %384 = shalt.err (!%p381_p6)
}
 0x1e6   :  { %s385_s6 = scalar_lea.hbm %s525_s7, 128 }
 0x1e7   :  { %p386_p7 = scmp.ne.s32.totalorder %s525_s7, %s385_s6  ;;  %p389_p8 = scmp.lt.u32.totalorder %s385_s6, %s525_s7 }
 0x1e9   :  { %p391_p9 = pnand %p389_p8, %p386_p7 }
 0x1eb   :  { %394 = shalt.err (!%p391_p9)
}
 0x1ec   :  { %265 = dma.vmem_to_hbm [thread:$0]  %s263_s14, 128, %s525_s7, [#allocation4]  }
 0x1ed   :  { %399 = dma.done.wait [#allocation4], 128  }
 0x1ee   :  { %400 = vsyncadd [#allocation4], 4294967168 }
 0x1ef   :  { %269 = vsyncpa [#allocation3], 1 }
 0x1f0   :  { %270 = vsyncpa [#allocation6], 1 }
 0x1f1   :  { %271 = vsyncpa [#allocation4], 1 }

</bundles_post_ra>
